<compile_context>
chip_gen: v6e
topology: v6e:2x2x1
jax: 0.10.0
libtpu: 0.0.40
codegen_flags: <defaults>
</compile_context>

<pallas_src>
import functools

import jax
import jax.numpy as jnp
from jax.experimental import pallas as pl
from jax.experimental.pallas import tpu as pltpu


def _avg_concat_last_k_kernel(*refs, k, precision):
    # refs = (inv_ref, mask_ref, layer_ref_0..layer_ref_{k-1}, out_ref)
    inv_ref = refs[0]
    mask_ref = refs[1]
    layer_refs = refs[2:2 + k]
    out_ref = refs[2 + k]

    s_idx = pl.program_id(2)

    @pl.when(s_idx == 0)
    def _init():
        out_ref[...] = jnp.zeros_like(out_ref)

    # (B_t, 1, S_t) operand: the masked sum over S becomes one MXU matmul per
    # layer (mask values are 0/1, exact in bf16 as well).
    mask_mm = mask_ref[...][:, None, :]

    for i, lref in enumerate(layer_refs):
        num = jnp.einsum(
            "bqs,bsh->bqh", mask_mm, lref[...],
            preferred_element_type=jnp.float32,
            precision=precision)                     # (B_t, 1, H_t) f32
        out_ref[i] += num[:, 0, :]                   # accumulate in the out block

    @pl.when(s_idx == pl.num_programs(2) - 1)
    def _finalize():
        # Exact reciprocal of (sum(mask) + tol), computed in the wrapper.
        out_ref[...] = out_ref[...] * inv_ref[...][None, :, :]


def _round_up(x, m):
    return ((x + m - 1) // m) * m


def _vmem_capacity_bytes():
    try:
        return int(pltpu.get_tpu_info().vmem_capacity_bytes)
    except Exception:
        return 64 * 1024 * 1024  # conservative (v7x has 64 MiB per TensorCore)


def _plan_tiles(B, S, H, k, in_itemsize, mask_itemsize, budget):
    """Returns (B_pad, S_pad, B_t, S_t, H_t)."""

    def input_bytes(bt, st, ht):
        # Double-buffered per-step input DMAs (k layer tiles + mask tile).
        return 2 * (k * bt * st * ht * in_itemsize + bt * st * mask_itemsize)

    # Batch: full-B block (no pad, always legal) or multiples of 8 of padded B.
    b_cands = {(B, B)}
    if B > 8:
        bp = _round_up(B, 8)
        b_cands |= {(bp, bt) for bt in range(8, bp + 1, 8) if bp % bt == 0}
    # Sequence: full-S block (no pad) or multiples of 128 of padded S.
    s_cands = {(S, S)}
    if S > 128:
        sp = _round_up(S, 128)
        s_cands |= {(sp, st) for st in range(128, sp + 1, 128) if sp % st == 0}
    # Hidden: full H, plus 128-multiples dividing H (only used when needed).
    h_cands = {H}
    if H > 128 and H % 128 == 0:
        h_cands |= {ht for ht in range(128, H, 128) if H % ht == 0}

    best = None
    for bp, bt in sorted(b_cands):
        for sp, st in sorted(s_cands):
            for ht in sorted(h_cands):
                if input_bytes(bt, st, ht) > budget:
                    continue
                key = (
                    (bp // bt) * (H // ht) >= 2,  # feed both v7x TensorCores
                    ht == H,                      # avoid H tiling when possible
                    sp == S,                      # avoid padding layers along S
                    bp == B,                      # avoid padding along B
                    bt * st * ht,                 # then: largest per-step DMA
                )
                if best is None or key > best[0]:
                    best = (key, bp, sp, bt, st, ht)
    if best is not None:
        return best[1:]

    # Nothing fits the budget: smallest aligned tiles; the caller raises (and
    # clamps) the scoped-VMEM limit instead of silently using one huge block.
    # TODO(synk): tile H below 128 / handle non-128-aligned H if even this
    # minimal configuration exceeds physical VMEM.
    bp = _round_up(B, 8) if B > 8 else B
    bt = 8 if B > 8 else B
    sp = _round_up(S, 128) if S > 128 else S
    st = 128 if S > 128 else S
    ht = min(h_cands)
    return bp, sp, bt, st, ht


def average_concat_last_k(encoded_layers, pad_mask, k=4, tol=1e-6):
    """encoded_layers: list of [B, S, H] arrays; pad_mask: [B, S] -> [B, k*H]."""
    assert k <= len(encoded_layers), (
        "k should be less than the number of encoder layers")
    layers = list(encoded_layers[-k:])
    B, S, H = layers[0].shape
    for l in layers:
        assert l.shape == (B, S, H)
    assert pad_mask.shape == (B, S)

    in_dtype = layers[0].dtype
    in_itemsize = jnp.dtype(in_dtype).itemsize
    mask = pad_mask.astype(in_dtype)          # 0/1 values -> exact in bf16 too
    mask_itemsize = jnp.dtype(mask.dtype).itemsize

    # Exact denominator reciprocal, computed once on the original mask.
    inv = 1.0 / (jnp.sum(pad_mask.astype(jnp.float32), axis=1, keepdims=True) + tol)

    vmem_cap = _vmem_capacity_bytes()
    # ~25 MiB input budget on v7x (64 MiB VMEM), ~51 MiB on 128-MiB v5e/v6e.
    budget = min(int(0.40 * vmem_cap), 56 * 1024 * 1024)
    B_p, S_p, B_t, S_t, H_t = _plan_tiles(
        B, S, H, k, in_itemsize, mask_itemsize, budget)

    # Padding is semantically free: padded tokens have mask 0 (zero numerator
    # contribution; denominator uses the original mask), padded batch rows are
    # sliced off below.
    if S_p != S:
        mask = jnp.pad(mask, ((0, 0), (0, S_p - S)))
        layers = [jnp.pad(l, ((0, 0), (0, S_p - S), (0, 0))) for l in layers]
    if B_p != B:
        mask = jnp.pad(mask, ((0, B_p - B), (0, 0)))
        layers = [jnp.pad(l, ((0, B_p - B), (0, 0), (0, 0))) for l in layers]
        inv = jnp.pad(inv, ((0, B_p - B), (0, 0)), constant_values=1.0)

    grid = (B_p // B_t, H // H_t, S_p // S_t)

    # Full f32 matmul precision for f32 inputs (default would truncate to bf16
    # on the MXU); bf16 inputs already accumulate exactly in f32.
    precision = jax.lax.Precision.HIGHEST if in_dtype == jnp.float32 else None
    kernel = functools.partial(_avg_concat_last_k_kernel, k=k, precision=precision)

    in_specs = [
        pl.BlockSpec((B_t, 1), lambda b, h, s: (b, 0)),              # 1/denominator
        pl.BlockSpec((B_t, S_t), lambda b, h, s: (b, s)),            # mask
    ] + [
        pl.BlockSpec((B_t, S_t, H_t), lambda b, h, s: (b, s, h))     # each layer
        for _ in range(k)
    ]
    # [k, B, H] output: aligned (B_t, H_t) minor tiles, lane-dense stores; the
    # block is revisited across the trailing S axis, so it stays VMEM-resident
    # and is used directly as the f32 accumulator.
    out_specs = pl.BlockSpec((k, B_t, H_t), lambda b, h, s: (0, b, h))

    # Scoped-VMEM sizing: double-buffered inputs + output block, clamped to the
    # physical capacity minus headroom (never exceed v7x's 64 MiB).
    est = (2 * (k * B_t * S_t * H_t * in_itemsize
                + B_t * S_t * mask_itemsize
                + B_t * 128 * 4)
           + 2 * k * max(B_t, 8) * H_t * 4)
    compiler_kwargs = dict(
        dimension_semantics=("parallel", "parallel", "arbitrary"))
    limit = int(1.25 * est) + (4 << 20)
    if limit > 12 * 1024 * 1024:
        cap = max(vmem_cap - (8 << 20), 16 << 20)
        compiler_kwargs["vmem_limit_bytes"] = int(min(limit, cap))

    out = pl.pallas_call(
        kernel,
        out_shape=jax.ShapeDtypeStruct((k, B_p, H), jnp.float32),
        grid=grid,
        in_specs=in_specs,
        out_specs=out_specs,
        compiler_params=pltpu.CompilerParams(**compiler_kwargs),
    )(inv, mask, *layers)

    # [k, B, H] -> [B, k*H]; matches torch.cat(encoded_layers[-k:], dim=2).
    return out.transpose(1, 0, 2).reshape(B_p, k * H)[:B]


def _reference(encoded_layers, pad_mask, k=4, tol=1e-6):
    enc = jnp.concatenate(
        [l.astype(jnp.float32) for l in encoded_layers[-k:]], axis=2)   # (B,S,k*H)
    m = pad_mask[:, :, None].astype(jnp.float32)
    enc = enc * m
    return jnp.sum(enc, axis=1) / (jnp.sum(m, axis=1) + tol)


if __name__ == "__main__":
    key = jax.random.PRNGKey(0)
    B, S, H = 2, 8, 32
    num_layers, k = 6, 4

    keys = jax.random.split(key, num_layers + 1)
    encoded_layers = [
        jax.random.normal(keys[i], (B, S, H), dtype=jnp.float32)
        for i in range(num_layers)
    ]
    # Binary padding mask (1 = keep, 0 = pad); guarantee >= 1 valid token/row.
    pad_mask = (jax.random.uniform(keys[-1], (B, S)) > 0.3).astype(jnp.float32)
    pad_mask = pad_mask.at[:, 0].set(1.0)

    # float32 path (HIGHEST-precision MXU matmul, exact reciprocal).
    out = average_concat_last_k(encoded_layers, pad_mask, k=k, tol=1e-6)
    out = jax.block_until_ready(out)
    ref = _reference(encoded_layers, pad_mask, k=k, tol=1e-6)
    assert out.shape == (B, k * H)
    assert jnp.allclose(out, ref, atol=1e-4, rtol=1e-4), "f32 mismatch vs reference"

    # bfloat16 path (bf16 MXU matmul with f32 accumulation).
    enc_bf16 = [l.astype(jnp.bfloat16) for l in encoded_layers]
    out_bf16 = jax.block_until_ready(
        average_concat_last_k(enc_bf16, pad_mask, k=k, tol=1e-6))
    ref_bf16 = _reference(enc_bf16, pad_mask, k=k, tol=1e-6)
    assert jnp.allclose(out_bf16, ref_bf16, atol=2e-2, rtol=2e-2), "bf16 mismatch"

    print("KERNEL_OK")
</pallas_src>

<mosaic_0001>
module attributes {stable_mosaic.version = 11 : i64} {
  func.func @_avg_concat_last_k_kernel(%arg0: i32, %arg1: i32, %arg2: i32, %arg3: memref<2x1xf32, #tpu.memory_space<vmem>>, %arg4: memref<2x8xf32, #tpu.memory_space<vmem>>, %arg5: memref<2x8x32xf32, #tpu.memory_space<vmem>>, %arg6: memref<2x8x32xf32, #tpu.memory_space<vmem>>, %arg7: memref<2x8x32xf32, #tpu.memory_space<vmem>>, %arg8: memref<2x8x32xf32, #tpu.memory_space<vmem>>, %arg9: memref<4x2x32xf32, #tpu.memory_space<vmem>>) attributes {dimension_semantics = [#tpu.dimension_semantics<parallel>, #tpu.dimension_semantics<parallel>, #tpu.dimension_semantics<arbitrary>], iteration_bounds = array<i64: 1, 1, 1>, scalar_prefetch = 0 : i64, scratch_operands = 0 : i64, tpu.core_type = #tpu.core_type<tc>, window_params = [{transform_indices = @transform_0, window_bounds = array<i64: 2, 1>}, {transform_indices = @transform_1, window_bounds = array<i64: 2, 8>}, {transform_indices = @transform_2, window_bounds = array<i64: 2, 8, 32>}, {transform_indices = @transform_3, window_bounds = array<i64: 2, 8, 32>}, {transform_indices = @transform_4, window_bounds = array<i64: 2, 8, 32>}, {transform_indices = @transform_5, window_bounds = array<i64: 2, 8, 32>}, {transform_indices = @transform_6, window_bounds = array<i64: 4, 2, 32>}]} {
    %c0_i32 = arith.constant 0 : i32
    %0 = arith.cmpi eq, %arg2, %c0_i32 : i32
    %1 = arith.extui %0 : i1 to i32
    %c0_i32_0 = arith.constant 0 : i32
    %2 = arith.cmpi ne, %1, %c0_i32_0 : i32
    scf.if %2 {
      %cst_40 = arith.constant 0.000000e+00 : f32
      %44 = vector.broadcast %cst_40 : f32 to vector<4x2x32xf32>
      %c0_41 = arith.constant 0 : index
      %c0_42 = arith.constant 0 : index
      %c0_43 = arith.constant 0 : index
      %45 = vector.load %arg9[%c0_41, %c0_42, %c0_43] : memref<4x2x32xf32, #tpu.memory_space<vmem>>, vector<4x2x32xf32>
      tpu.vector_store %arg9[%c0_41, %c0_42, %c0_43], %44 {strides = array<i32>} : memref<4x2x32xf32, #tpu.memory_space<vmem>>, vector<4x2x32xf32>,
    } else {
    }
    %c0 = arith.constant 0 : index
    %c0_1 = arith.constant 0 : index
    %3 = vector.load %arg4[%c0, %c0_1] : memref<2x8xf32, #tpu.memory_space<vmem>>, vector<2x8xf32>
    %4 = vector.shape_cast %3 : vector<2x8xf32> to vector<2x1x8xf32>
    %c0_2 = arith.constant 0 : index
    %c0_3 = arith.constant 0 : index
    %c0_4 = arith.constant 0 : index
    %5 = vector.load %arg5[%c0_2, %c0_3, %c0_4] : memref<2x8x32xf32, #tpu.memory_space<vmem>>, vector<2x8x32xf32>
    "tpu.trace_start"() <{level = 10 : i32, message = "bqs,bsh->bqh"}> : () -> ()
    %cst = arith.constant dense<0.000000e+00> : vector<2x1x32xf32>
    %6 = tpu.matmul %4, %5, %cst {dimension_numbers = #tpu.dot_dimension_numbers<[2], [1], [1], [2], [0, 0, 0, 1, 1, 2], [0], [0]>, precision = #tpu.contract_precision<fp32>} : vector<2x1x8xf32>, vector<2x8x32xf32>, vector<2x1x32xf32> -> vector<2x1x32xf32>
    "tpu.trace_stop"() : () -> ()
    %c0_5 = arith.constant 0 : index
    %c0_6 = arith.constant 0 : index
    %c0_7 = arith.constant 0 : index
    %7 = vector.load %arg9[%c0_5, %c0_6, %c0_7] : memref<4x2x32xf32, #tpu.memory_space<vmem>>, vector<1x2x32xf32>
    %8 = vector.shape_cast %7 : vector<1x2x32xf32> to vector<2x32xf32>
    %9 = vector.shape_cast %6 : vector<2x1x32xf32> to vector<2x32xf32>
    %10 = arith.addf %8, %9 : vector<2x32xf32>
    %c0_8 = arith.constant 0 : index
    %c0_9 = arith.constant 0 : index
    %c0_10 = arith.constant 0 : index
    %11 = vector.load %arg9[%c0_8, %c0_9, %c0_10] : memref<4x2x32xf32, #tpu.memory_space<vmem>>, vector<1x2x32xf32>
    %12 = vector.shape_cast %11 : vector<1x2x32xf32> to vector<2x32xf32>
    %13 = vector.shape_cast %10 : vector<2x32xf32> to vector<1x2x32xf32>
    tpu.vector_store %arg9[%c0_8, %c0_9, %c0_10], %13 {strides = array<i32>} : memref<4x2x32xf32, #tpu.memory_space<vmem>>, vector<1x2x32xf32>,
    %c0_11 = arith.constant 0 : index
    %c0_12 = arith.constant 0 : index
    %c0_13 = arith.constant 0 : index
    %14 = vector.load %arg6[%c0_11, %c0_12, %c0_13] : memref<2x8x32xf32, #tpu.memory_space<vmem>>, vector<2x8x32xf32>
    "tpu.trace_start"() <{level = 10 : i32, message = "bqs,bsh->bqh"}> : () -> ()
    %cst_14 = arith.constant dense<0.000000e+00> : vector<2x1x32xf32>
    %15 = tpu.matmul %4, %14, %cst_14 {dimension_numbers = #tpu.dot_dimension_numbers<[2], [1], [1], [2], [0, 0, 0, 1, 1, 2], [0], [0]>, precision = #tpu.contract_precision<fp32>} : vector<2x1x8xf32>, vector<2x8x32xf32>, vector<2x1x32xf32> -> vector<2x1x32xf32>
    "tpu.trace_stop"() : () -> ()
    %c1 = arith.constant 1 : index
    %c0_15 = arith.constant 0 : index
    %c0_16 = arith.constant 0 : index
    %16 = vector.load %arg9[%c1, %c0_15, %c0_16] : memref<4x2x32xf32, #tpu.memory_space<vmem>>, vector<1x2x32xf32>
    %17 = vector.shape_cast %16 : vector<1x2x32xf32> to vector<2x32xf32>
    %18 = vector.shape_cast %15 : vector<2x1x32xf32> to vector<2x32xf32>
    %19 = arith.addf %17, %18 : vector<2x32xf32>
    %c1_17 = arith.constant 1 : index
    %c0_18 = arith.constant 0 : index
    %c0_19 = arith.constant 0 : index
    %20 = vector.load %arg9[%c1_17, %c0_18, %c0_19] : memref<4x2x32xf32, #tpu.memory_space<vmem>>, vector<1x2x32xf32>
    %21 = vector.shape_cast %20 : vector<1x2x32xf32> to vector<2x32xf32>
    %22 = vector.shape_cast %19 : vector<2x32xf32> to vector<1x2x32xf32>
    tpu.vector_store %arg9[%c1_17, %c0_18, %c0_19], %22 {strides = array<i32>} : memref<4x2x32xf32, #tpu.memory_space<vmem>>, vector<1x2x32xf32>,
    %c0_20 = arith.constant 0 : index
    %c0_21 = arith.constant 0 : index
    %c0_22 = arith.constant 0 : index
    %23 = vector.load %arg7[%c0_20, %c0_21, %c0_22] : memref<2x8x32xf32, #tpu.memory_space<vmem>>, vector<2x8x32xf32>
    "tpu.trace_start"() <{level = 10 : i32, message = "bqs,bsh->bqh"}> : () -> ()
    %cst_23 = arith.constant dense<0.000000e+00> : vector<2x1x32xf32>
    %24 = tpu.matmul %4, %23, %cst_23 {dimension_numbers = #tpu.dot_dimension_numbers<[2], [1], [1], [2], [0, 0, 0, 1, 1, 2], [0], [0]>, precision = #tpu.contract_precision<fp32>} : vector<2x1x8xf32>, vector<2x8x32xf32>, vector<2x1x32xf32> -> vector<2x1x32xf32>
    "tpu.trace_stop"() : () -> ()
    %c2 = arith.constant 2 : index
    %c0_24 = arith.constant 0 : index
    %c0_25 = arith.constant 0 : index
    %25 = vector.load %arg9[%c2, %c0_24, %c0_25] : memref<4x2x32xf32, #tpu.memory_space<vmem>>, vector<1x2x32xf32>
    %26 = vector.shape_cast %25 : vector<1x2x32xf32> to vector<2x32xf32>
    %27 = vector.shape_cast %24 : vector<2x1x32xf32> to vector<2x32xf32>
    %28 = arith.addf %26, %27 : vector<2x32xf32>
    %c2_26 = arith.constant 2 : index
    %c0_27 = arith.constant 0 : index
    %c0_28 = arith.constant 0 : index
    %29 = vector.load %arg9[%c2_26, %c0_27, %c0_28] : memref<4x2x32xf32, #tpu.memory_space<vmem>>, vector<1x2x32xf32>
    %30 = vector.shape_cast %29 : vector<1x2x32xf32> to vector<2x32xf32>
    %31 = vector.shape_cast %28 : vector<2x32xf32> to vector<1x2x32xf32>
    tpu.vector_store %arg9[%c2_26, %c0_27, %c0_28], %31 {strides = array<i32>} : memref<4x2x32xf32, #tpu.memory_space<vmem>>, vector<1x2x32xf32>,
    %c0_29 = arith.constant 0 : index
    %c0_30 = arith.constant 0 : index
    %c0_31 = arith.constant 0 : index
    %32 = vector.load %arg8[%c0_29, %c0_30, %c0_31] : memref<2x8x32xf32, #tpu.memory_space<vmem>>, vector<2x8x32xf32>
    "tpu.trace_start"() <{level = 10 : i32, message = "bqs,bsh->bqh"}> : () -> ()
    %cst_32 = arith.constant dense<0.000000e+00> : vector<2x1x32xf32>
    %33 = tpu.matmul %4, %32, %cst_32 {dimension_numbers = #tpu.dot_dimension_numbers<[2], [1], [1], [2], [0, 0, 0, 1, 1, 2], [0], [0]>, precision = #tpu.contract_precision<fp32>} : vector<2x1x8xf32>, vector<2x8x32xf32>, vector<2x1x32xf32> -> vector<2x1x32xf32>
    "tpu.trace_stop"() : () -> ()
    %c3 = arith.constant 3 : index
    %c0_33 = arith.constant 0 : index
    %c0_34 = arith.constant 0 : index
    %34 = vector.load %arg9[%c3, %c0_33, %c0_34] : memref<4x2x32xf32, #tpu.memory_space<vmem>>, vector<1x2x32xf32>
    %35 = vector.shape_cast %34 : vector<1x2x32xf32> to vector<2x32xf32>
    %36 = vector.shape_cast %33 : vector<2x1x32xf32> to vector<2x32xf32>
    %37 = arith.addf %35, %36 : vector<2x32xf32>
    %c3_35 = arith.constant 3 : index
    %c0_36 = arith.constant 0 : index
    %c0_37 = arith.constant 0 : index
    %38 = vector.load %arg9[%c3_35, %c0_36, %c0_37] : memref<4x2x32xf32, #tpu.memory_space<vmem>>, vector<1x2x32xf32>
    %39 = vector.shape_cast %38 : vector<1x2x32xf32> to vector<2x32xf32>
    %40 = vector.shape_cast %37 : vector<2x32xf32> to vector<1x2x32xf32>
    tpu.vector_store %arg9[%c3_35, %c0_36, %c0_37], %40 {strides = array<i32>} : memref<4x2x32xf32, #tpu.memory_space<vmem>>, vector<1x2x32xf32>,
    %c0_i32_38 = arith.constant 0 : i32
    %41 = arith.cmpi eq, %arg2, %c0_i32_38 : i32
    %42 = arith.extui %41 : i1 to i32
    %c0_i32_39 = arith.constant 0 : i32
    %43 = arith.cmpi ne, %42, %c0_i32_39 : i32
    scf.if %43 {
      %c0_40 = arith.constant 0 : index
      %c0_41 = arith.constant 0 : index
      %c0_42 = arith.constant 0 : index
      %44 = vector.load %arg9[%c0_40, %c0_41, %c0_42] : memref<4x2x32xf32, #tpu.memory_space<vmem>>, vector<4x2x32xf32>
      %c0_43 = arith.constant 0 : index
      %c0_44 = arith.constant 0 : index
      %45 = vector.load %arg3[%c0_43, %c0_44] : memref<2x1xf32, #tpu.memory_space<vmem>>, vector<2x1xf32>
      %46 = vector.shape_cast %45 : vector<2x1xf32> to vector<1x2x1xf32>
      %47 = vector.broadcast %46 : vector<1x2x1xf32> to vector<4x2x32xf32>
      %48 = arith.mulf %44, %47 : vector<4x2x32xf32>
      %c0_45 = arith.constant 0 : index
      %c0_46 = arith.constant 0 : index
      %c0_47 = arith.constant 0 : index
      %49 = vector.load %arg9[%c0_45, %c0_46, %c0_47] : memref<4x2x32xf32, #tpu.memory_space<vmem>>, vector<4x2x32xf32>
      tpu.vector_store %arg9[%c0_45, %c0_46, %c0_47], %48 {strides = array<i32>} : memref<4x2x32xf32, #tpu.memory_space<vmem>>, vector<4x2x32xf32>,
    } else {
    }
    return
  }
  func.func @transform_0(%arg0: i32, %arg1: i32, %arg2: i32) -> (i32, i32) {
    %c0_i32 = arith.constant 0 : i32
    %c0_i32_0 = arith.constant 0 : i32
    return %arg0, %c0_i32 : i32, i32
  }
  func.func @transform_1(%arg0: i32, %arg1: i32, %arg2: i32) -> (i32, i32) {
    %c0_i32 = arith.constant 0 : i32
    return %arg0, %arg2 : i32, i32
  }
  func.func @transform_2(%arg0: i32, %arg1: i32, %arg2: i32) -> (i32, i32, i32) {
    %c0_i32 = arith.constant 0 : i32
    return %arg0, %arg2, %arg1 : i32, i32, i32
  }
  func.func @transform_3(%arg0: i32, %arg1: i32, %arg2: i32) -> (i32, i32, i32) {
    %c0_i32 = arith.constant 0 : i32
    return %arg0, %arg2, %arg1 : i32, i32, i32
  }
  func.func @transform_4(%arg0: i32, %arg1: i32, %arg2: i32) -> (i32, i32, i32) {
    %c0_i32 = arith.constant 0 : i32
    return %arg0, %arg2, %arg1 : i32, i32, i32
  }
  func.func @transform_5(%arg0: i32, %arg1: i32, %arg2: i32) -> (i32, i32, i32) {
    %c0_i32 = arith.constant 0 : i32
    return %arg0, %arg2, %arg1 : i32, i32, i32
  }
  func.func @transform_6(%arg0: i32, %arg1: i32, %arg2: i32) -> (i32, i32, i32) {
    %c0_i32 = arith.constant 0 : i32
    %c0_i32_0 = arith.constant 0 : i32
    return %c0_i32, %arg0, %arg1 : i32, i32, i32
  }
}

</mosaic_0001>

<bundles_post_ra>
// kernel: tpu_custom_call.1
= control target key start
LH: loop header
LB: loop body
LE: loop exit
PB: predicated region body
PF: predicated region fallthrough
CT: control target
= control target key end

     0   :  { %11 = vsyncpa [#allocation3], 0  ;;  %s4621_s0 = inlined_call_operand.vmem [shape: f32[2,1], index: 0, kind: input, shape index: {}]   ;;  %s4622_s1 = inlined_call_operand.vmem [shape: f32[2,8], index: 1, kind: input, shape index: {}]   ;;  %s4623_s2 = inlined_call_operand.hbm [shape: f32[2,8,32], index: 2, kind: input, shape index: {}]   ;;  %s4624_s3 = inlined_call_operand.hbm [shape: f32[2,8,32], index: 3, kind: input, shape index: {}]   ;;  %s4625_s4 = inlined_call_operand.hbm [shape: f32[2,8,32], index: 4, kind: input, shape index: {}]   ;;  %s4626_s5 = inlined_call_operand.hbm [shape: f32[2,8,32], index: 5, kind: input, shape index: {}]   ;;  %s4627_s6 = inlined_call_operand.hbm [shape: f32[4,2,32], index: 6, kind: output, shape index: {}]  }
   0x1   :  { %12 = vsyncpa [#allocation6], 0 }
   0x2   :  { %13 = vsyncpa [#allocation9], 0 }
   0x3   :  { %14 = vsyncpa [#allocation4], 0  ;;  %s4229_s21 = smov [#allocation5]   ;;  %s4230_s23 = smov [#allocation2]  }
   0x4   :  { %s36_s22 = sshll.u32 %s4229_s21, 4  ;;  %s24_s24 = sshll.u32 %s4230_s23, 4  ;;  %s37_s22 = int_to_ptr.vmem [resolvable:$true] %s36_s22  ;;  %s25_s24 = int_to_ptr.vmem [resolvable:$true] %s24_s24 }
   0x5   :  { %s4129_s25 = scalar_lea.vmem %s37_s22, 256  ;;  %p4134_p1 = scmp.lt.s32.totalorder %s37_s22, %s37_s22 }
   0x6   :  { %p4130_p0 = scmp.ne.s32.totalorder %s37_s22, %s4129_s25  ;;  %p4135_p2 = scmp.lt.s32.totalorder %s4129_s25, %s4129_s25 }
   0x8   :  { %p4136_p3 = por %p4135_p2, %p4134_p1 }
   0xa   :  { %p4137_p4 = pnand %p4136_p3, %p4130_p0 }
   0xc   :  { %4140 = shalt.err (!%p4137_p4)
}
   0xd   :  { %s4231_s26 = smov 128   ;;  %s4232_s27 = smov 8  }
   0xe   :  { %42 = dma.hbm_to_vmem [thread:$0]  %s4624_s3, 256, %s37_s22, [#allocation6], %s4231_s26, %s4231_s26, %s4232_s27  }
   0xf   :  { %s4149_s30 = scalar_lea.vmem %s25_s24, 256  ;;  %p4154_p6 = scmp.lt.s32.totalorder %s25_s24, %s25_s24 }
  0x10   :  { %p4150_p5 = scmp.ne.s32.totalorder %s25_s24, %s4149_s30  ;;  %p4155_p7 = scmp.lt.s32.totalorder %s4149_s30, %s4149_s30 }
  0x12   :  { %p4156_p8 = por %p4155_p7, %p4154_p6 }
  0x14   :  { %p4157_p9 = pnand %p4156_p8, %p4150_p5 }
  0x16   :  { %4160 = shalt.err (!%p4157_p9)
}
  0x17   :  { %30 = dma.hbm_to_vmem [thread:$0]  %s4623_s2, 256, %s25_s24, [#allocation3], %s4231_s26, %s4231_s26, %s4232_s27  }
  0x18   :  { %s4233_s9 = smov [#allocation7]   ;;  %s4234_s11 = smov [#allocation8]  }
  0x19   :  { %s48_s10 = sshll.u32 %s4233_s9, 4  ;;  %s60_s12 = sshll.u32 %s4234_s11, 4  ;;  %s49_s10 = int_to_ptr.vmem [resolvable:$true] %s48_s10  ;;  %s61_s12 = int_to_ptr.vmem [resolvable:$true] %s60_s12 }
  0x1a   :  { %s4169_s3 = scalar_lea.vmem %s49_s10, 256  ;;  %p4174_p11 = scmp.lt.s32.totalorder %s49_s10, %s49_s10 }
  0x1b   :  { %p4170_p10 = scmp.ne.s32.totalorder %s49_s10, %s4169_s3  ;;  %p4175_p12 = scmp.lt.s32.totalorder %s4169_s3, %s4169_s3 }
  0x1d   :  { %p4176_p13 = por %p4175_p12, %p4174_p11 }
  0x1f   :  { %p4177_p0 = pnand %p4176_p13, %p4170_p10 }
  0x21   :  { %4180 = shalt.err (!%p4177_p0)
}
  0x22   :  { %54 = dma.hbm_to_vmem [thread:$0]  %s4625_s4, 256, %s49_s10, [#allocation6], %s4231_s26, %s4231_s26, %s4232_s27  }
  0x23   :  { %s4189_s2 = scalar_lea.vmem %s61_s12, 256  ;;  %p4194_p2 = scmp.lt.s32.totalorder %s61_s12, %s61_s12 }
  0x24   :  { %p4190_p1 = scmp.ne.s32.totalorder %s61_s12, %s4189_s2  ;;  %p4195_p3 = scmp.lt.s32.totalorder %s4189_s2, %s4189_s2 }
  0x26   :  { %p4196_p4 = por %p4195_p3, %p4194_p2 }
  0x28   :  { %p4197_p5 = pnand %p4196_p4, %p4190_p1 }
  0x2a   :  { %4200 = shalt.err (!%p4197_p5)
}
  0x2b   :  { %66 = dma.hbm_to_vmem [thread:$0]  %s4626_s5, 256, %s61_s12, [#allocation9], %s4231_s26, %s4231_s26, %s4232_s27  }
  0x2c   :  { %4221 = dma.done.wait [#allocation3], 256  }
  0x2d   :  { %4222 = vsyncadd [#allocation3], 4294967040 }
  0x2e   :  { %4223 = dma.done.wait [#allocation6], 512  }
  0x2f   :  { %4224 = vsyncadd [#allocation6], 4294966784 }
  0x30   :  { %4225 = dma.done.wait [#allocation9], 256  }
  0x31   :  { %4226 = vsyncadd [#allocation9], 4294967040  ;;  %v101_v0 = vlaneseq  ;;  %v4235_v1 = vmov 0.0   ;;  %v4236_v2 = vmov 1966171168   ;;  %vm4237_vm0 = vmmov 0  }
  0x32   :  { %3867 = vmatprep.subr.mxu0 %v4235_v1  ;;  %3872 = vmatprep.subr.mxu1 %v4235_v1  ;;  %v99_v3 = vunpack.c.l.s4 %v4236_v2  ;;  %v4238_v6 = vmov 0   ;;  %vm114_vm1 = vcmask 64512   ;;  %v112_v8 = vld [vmem:[#allocation2] sm:$0xff]  ;;  %v113_v10 = vld [vmem:[#allocation2 + $0x8] sm:$0xff]  ;;  %v1021_v31 = vld [vmem:[#allocation5] sm:$0xff]  ;;  %vm83_vm2 = vcmask 254976  }
  0x33   :  { %3869 = vmatprep.mubr.msk.f32.mxu0 %vm4237_vm0, %v4235_v1  ;;  %3874 = vmatprep.mubr.msk.f32.mxu1 %vm4237_vm0, %v4235_v1  ;;  %v102_v4 = vshrl.u32 %v101_v0, 7  ;;  %v3770_v9 = vld.sshfl [vmem:[%s4622_s1] sm:$0x11 pattern:$0x75316420]  ;;  %v148_v11 = vand.u32 4294901760, %v112_v8 }
  0x34   :  { %v100_v5 = vunpack.c.0.s8 %v99_v3  ;;  %4120 = vset.pattern.permute.xlu0 %v4238_v6  ;;  %v4310_v13 = vand.u32 4294901760, %v113_v10  ;;  %v97_v14 = vcombine.high %v3770_v9, %v3770_v9  ;;  %v3737_v18 = vld [vmem:[%s4621_s0] sm:$0x3]  ;;  %v4344_v34 = vand.u32 4294901760, %v1021_v31  ;;  %v1022_v41 = vld [vmem:[#allocation5 + $0x8] sm:$0xff]  ;;  %v1925_v53 = vld [vmem:[#allocation7 + $0x8] sm:$0xff] }
  0x35   :  { %3868 = vmatpush3.msra.mxu0 %v148_v11  ;;  %v225_v15 = vsub.f32 %v112_v8, %v148_v11  ;;  %3740 = vperm.xlu0 %4120, %v3737_v18   ;;  %v4384_v43 = vand.u32 4294901760, %v1022_v41  ;;  %v1924_v47 = vld [vmem:[#allocation7] sm:$0xff]  ;;  %v4454_v55 = vand.u32 4294901760, %v1925_v53  ;;  %v2827_v59 = vld [vmem:[#allocation8] sm:$0xff]  ;;  %v2828_v2 = vld [vmem:[#allocation8 + $0x8] sm:$0xff]  ;;  %vm1015_vm3 = vcmask 1041409  }
  0x36   :  { %v103_v7 = vsub.s32 %v100_v5, %v102_v4  ;;  %3877 = vmatprep.subr.mxu0 %v4235_v1  ;;  %v4320_v21 = vsub.f32 %v113_v10, %v4310_v13  ;;  %v4358_v37 = vsub.f32 %v1021_v31, %v4344_v34  ;;  %v4419_v49 = vand.u32 4294901760, %v1924_v47  ;;  %84 = vst.msk [vmem:[#allocation10] sm:$0x3] %vm83_vm2, %v4235_v1  ;;  %s4239_s0 = smov [#allocation10]  }
  0x37   :  { %v226_v20 = vand.u32 4294901760, %v225_v15  ;;  %v4397_v45 = vsub.f32 %v1022_v41, %v4384_v43  ;;  %v4467_v57 = vsub.f32 %v1925_v53, %v4454_v55  ;;  %v4489_v61 = vand.u32 4294901760, %v2827_v59  ;;  %85 = vst.msk [vmem:[#allocation10 + $0x2] sm:$0x3] %vm83_vm2, %v4235_v1  ;;  %86 = vst.msk [vmem:[#allocation10 + $0x4] sm:$0x3] %vm83_vm2, %v4235_v1 }
  0x38   :  { %v104_v12 = vrot.slane %v3770_v9, %v103_v7  ;;  %v111_v17 = vrot.slane %v97_v14, %v103_v7  ;;  %v674_v28 = vand.u32 4294901760, %v4320_v21  ;;  %v1132_v39 = vand.u32 4294901760, %v4358_v37  ;;  %87 = vst.msk [vmem:[#allocation10 + $0x6] sm:$0x3] %vm83_vm2, %v4235_v1  ;;  %s3756_s1 = sshll.u32 %s4239_s0, 4  ;;  %s3757_s1 = int_to_ptr.vmem [resolvable:$true] %s3756_s1 }
  0x39   :  { %v227_v25 = vsub.f32 %v225_v15, %v226_v20  ;;  %v1578_v46 = vand.u32 4294901760, %v4397_v45  ;;  %v4432_v51 = vsub.f32 %v1924_v47, %v4419_v49  ;;  %v2481_v58 = vand.u32 4294901760, %v4467_v57  ;;  %s4201_s19 = scalar_lea.vmem %s3757_s1, 128  ;;  %p4206_p7 = scmp.lt.s32.totalorder %s3757_s1, %s3757_s1 }
  0x3a   :  { %v115_v16 = vsel %vm114_vm1, %v104_v12, 0  ;;  %v563_v22 = vsel %vm114_vm1, %v111_v17, 0  ;;  %v675_v33 = vsub.f32 %v4320_v21, %v674_v28  ;;  %v1133_v42 = vsub.f32 %v4358_v37, %v1132_v39  ;;  %p4202_p6 = scmp.ne.s32.totalorder %s3757_s1, %s4201_s19  ;;  %p4207_p8 = scmp.lt.s32.totalorder %s4201_s19, %s4201_s19 }
  0x3b   :  { %v4317_v19 = vand.u32 4294901760, %v115_v16  ;;  %v4326_v24 = vand.u32 4294901760, %v563_v22  ;;  %v228_v27 = vand.u32 4294901760, %v227_v25  ;;  %v1579_v48 = vsub.f32 %v4397_v45, %v1578_v46 }
  0x3c   :  { %v676_v36 = vand.u32 4294901760, %v675_v33  ;;  %v1134_v44 = vand.u32 4294901760, %v1133_v42  ;;  %v2035_v52 = vand.u32 4294901760, %v4432_v51  ;;  %v2482_v60 = vsub.f32 %v4467_v57, %v2481_v58  ;;  %p4208_p9 = por %p4207_p8, %p4206_p7 }
  0x3d   :  { %v4324_v23 = vsub.f32 %v115_v16, %v4317_v19  ;;  %v4335_v30 = vsub.f32 %v563_v22, %v4326_v24  ;;  %3873 = vmatpush3.msra.mxu1 %v228_v27  ;;  %v1580_v50 = vand.u32 4294901760, %v1579_v48  ;;  %v2937_v63 = vsub.f32 %v2827_v59, %v4489_v61 }
  0x3e   :  { %3875 = vmatmul.mubr.f32.vlgmr.msra.gmra.mxu1 %v4317_v19  ;;  %3882 = vmatprep.subr.mxu1 %v4235_v1  ;;  %v2036_v54 = vsub.f32 %v4432_v51, %v2035_v52  ;;  %v2483_v62 = vand.u32 4294901760, %v2482_v60  ;;  %v4520_v4 = vand.u32 4294901760, %v2828_v2  ;;  %p4209_p10 = pnand %p4208_p9, %p4202_p6 }
  0x3f   :  { %v4329_v26 = vand.u32 4294901760, %v4324_v23  ;;  %3883 = vmatpush3.msra.mxu1 %v148_v11  ;;  %3884 = vmatprep.mubr.msk.f32.mxu1 %vm4237_vm0, %v4235_v1  ;;  %v4349_v35 = vand.u32 4294901760, %v4335_v30  ;;  %v2938_v0 = vand.u32 4294901760, %v2937_v63 }
  0x40   :  { %3892 = vmatprep.subr.mxu1 %v4235_v1  ;;  %v2037_v56 = vand.u32 4294901760, %v2036_v54  ;;  %v3383_v6 = vsub.f32 %v2828_v2, %v4520_v4 }
  0x41   :  { %v186_v29 = vsub.f32 %v4324_v23, %v4329_v26  ;;  %v634_v38 = vsub.f32 %v4335_v30, %v4349_v35  ;;  %v2939_v3 = vsub.f32 %v2937_v63, %v2938_v0 }
  0x42   :  { %3885 = vmatmul.mubr.f32.vlgmr.msra.gmra.mxu1 %v4329_v26  ;;  %v3384_v7 = vand.u32 4294901760, %v3383_v6 }
  0x43   :  { %v4337_v32 = vand.u32 4294901760, %v186_v29  ;;  %3893 = vmatpush3.msra.mxu1 %v148_v11  ;;  %3894 = vmatprep.mubr.msk.f32.mxu1 %vm4237_vm0, %v4235_v1  ;;  %v4372_v40 = vand.u32 4294901760, %v634_v38  ;;  %v2940_v5 = vand.u32 4294901760, %v2939_v3 }
  0x44   :  { %3902 = vmatprep.subr.mxu1 %v4235_v1  ;;  %v3385_v8 = vsub.f32 %v3383_v6, %v3384_v7 }
  0x45   :  { %3870 = vmatmul.mubr.f32.vlgmr.msra.gmra.mxu0 %v4337_v32 }
  0x46   :  { %3878 = vmatpush3.msra.mxu0 %v225_v15  ;;  %3879 = vmatprep.mubr.msk.f32.mxu0 %vm4237_vm0, %v4235_v1  ;;  %v3386_v9 = vand.u32 4294901760, %v3385_v8 }
  0x47   :  { %3887 = vmatprep.subr.mxu0 %v4235_v1  ;;  %3895 = vmatmul.mubr.f32.vlgmr.msra.gmra.mxu1 %v4317_v19 }
  0x48   :  { %3903 = vmatpush3.msra.mxu1 %v676_v36  ;;  %3904 = vmatprep.mubr.msk.f32.mxu1 %vm4237_vm0, %v4235_v1 }
  0x49   :  { %3880 = vmatmul.mubr.f32.vlgmr.msra.gmra.mxu0 %v4324_v23  ;;  %3912 = vmatprep.subr.mxu1 %v4235_v1 }
  0x4a   :  { %3888 = vmatpush3.msra.mxu0 %v226_v20  ;;  %3889 = vmatprep.mubr.msk.f32.mxu0 %vm4237_vm0, %v4235_v1 }
  0x4b   :  { %3897 = vmatprep.subr.mxu0 %v4235_v1  ;;  %3905 = vmatmul.mubr.f32.vlgmr.msra.gmra.mxu1 %v4326_v24 }
  0x4c   :  { %3913 = vmatpush3.msra.mxu1 %v4310_v13  ;;  %3914 = vmatprep.mubr.msk.f32.mxu1 %vm4237_vm0, %v4235_v1 }
  0x4d   :  { %3890 = vmatmul.mubr.f32.vlgmr.msra.gmra.mxu0 %v4317_v19  ;;  %3922 = vmatprep.subr.mxu1 %v4235_v1 }
  0x4e   :  { %3898 = vmatpush3.msra.mxu0 %v4310_v13  ;;  %3899 = vmatprep.mubr.msk.f32.mxu0 %vm4237_vm0, %v4235_v1 }
  0x4f   :  { %3907 = vmatprep.subr.mxu0 %v4235_v1  ;;  %3915 = vmatmul.mubr.f32.vlgmr.msra.gmra.mxu1 %v4349_v35 }
  0x50   :  { %3923 = vmatpush3.msra.mxu1 %v4310_v13  ;;  %3924 = vmatprep.mubr.msk.f32.mxu1 %vm4237_vm0, %v4235_v1 }
  0x51   :  { %3900 = vmatmul.mubr.f32.vlgmr.msra.gmra.mxu0 %v4372_v40  ;;  %3932 = vmatprep.subr.mxu1 %v4235_v1 }
  0x52   :  { %3908 = vmatpush3.msra.mxu0 %v4320_v21  ;;  %3909 = vmatprep.mubr.msk.f32.mxu0 %vm4237_vm0, %v4235_v1 }
  0x53   :  { %3917 = vmatprep.subr.mxu0 %v4235_v1  ;;  %3925 = vmatmul.mubr.f32.vlgmr.msra.gmra.mxu1 %v4326_v24 }
  0x54   :  { %3933 = vmatpush3.msra.mxu1 %v1134_v44  ;;  %3934 = vmatprep.mubr.msk.f32.mxu1 %vm4237_vm0, %v4235_v1 }
  0x55   :  { %3910 = vmatmul.mubr.f32.vlgmr.msra.gmra.mxu0 %v4335_v30  ;;  %3942 = vmatprep.subr.mxu1 %v4235_v1 }
  0x56   :  { %3918 = vmatpush3.msra.mxu0 %v674_v28  ;;  %3919 = vmatprep.mubr.msk.f32.mxu0 %vm4237_vm0, %v4235_v1 }
  0x57   :  { %3927 = vmatprep.subr.mxu0 %v4235_v1  ;;  %3935 = vmatmul.mubr.f32.vlgmr.msra.gmra.mxu1 %v4317_v19 }
  0x58   :  { %3943 = vmatpush3.msra.mxu1 %v4344_v34  ;;  %3944 = vmatprep.mubr.msk.f32.mxu1 %vm4237_vm0, %v4235_v1 }
  0x59   :  { %3920 = vmatmul.mubr.f32.vlgmr.msra.gmra.mxu0 %v4326_v24  ;;  %3952 = vmatprep.subr.mxu1 %v4235_v1 }
  0x5a   :  { %3928 = vmatpush3.msra.mxu0 %v4344_v34  ;;  %3929 = vmatprep.mubr.msk.f32.mxu0 %vm4237_vm0, %v4235_v1 }
  0x5b   :  { %3937 = vmatprep.subr.mxu0 %v4235_v1  ;;  %3945 = vmatmul.mubr.f32.vlgmr.msra.gmra.mxu1 %v4329_v26 }
  0x5c   :  { %3953 = vmatpush3.msra.mxu1 %v4344_v34  ;;  %3954 = vmatprep.mubr.msk.f32.mxu1 %vm4237_vm0, %v4235_v1 }
  0x5d   :  { %3930 = vmatmul.mubr.f32.vlgmr.msra.gmra.mxu0 %v4337_v32  ;;  %3962 = vmatprep.subr.mxu1 %v4235_v1 }
  0x5e   :  { %3938 = vmatpush3.msra.mxu0 %v4358_v37  ;;  %3939 = vmatprep.mubr.msk.f32.mxu0 %vm4237_vm0, %v4235_v1 }
  0x5f   :  { %3947 = vmatprep.subr.mxu0 %v4235_v1  ;;  %3955 = vmatmul.mubr.f32.vlgmr.msra.gmra.mxu1 %v4317_v19 }
  0x60   :  { %3963 = vmatpush3.msra.mxu1 %v1580_v50  ;;  %3964 = vmatprep.mubr.msk.f32.mxu1 %vm4237_vm0, %v4235_v1 }
  0x61   :  { %3940 = vmatmul.mubr.f32.vlgmr.msra.gmra.mxu0 %v4324_v23  ;;  %3972 = vmatprep.subr.mxu1 %v4235_v1 }
  0x62   :  { %3948 = vmatpush3.msra.mxu0 %v1132_v39  ;;  %3949 = vmatprep.mubr.msk.f32.mxu0 %vm4237_vm0, %v4235_v1 }
  0x63   :  { %3957 = vmatprep.subr.mxu0 %v4235_v1  ;;  %3965 = vmatmul.mubr.f32.vlgmr.msra.gmra.mxu1 %v4326_v24 }
  0x64   :  { %3973 = vmatpush3.msra.mxu1 %v4384_v43  ;;  %3974 = vmatprep.mubr.msk.f32.mxu1 %vm4237_vm0, %v4235_v1 }
  0x65   :  { %3950 = vmatmul.mubr.f32.vlgmr.msra.gmra.mxu0 %v4317_v19  ;;  %3982 = vmatprep.subr.mxu1 %v4235_v1 }
  0x66   :  { %3958 = vmatpush3.msra.mxu0 %v4384_v43  ;;  %3959 = vmatprep.mubr.msk.f32.mxu0 %vm4237_vm0, %v4235_v1 }
  0x67   :  { %3967 = vmatprep.subr.mxu0 %v4235_v1  ;;  %3975 = vmatmul.mubr.f32.vlgmr.msra.gmra.mxu1 %v4349_v35 }
  0x68   :  { %3983 = vmatpush3.msra.mxu1 %v4384_v43  ;;  %3984 = vmatprep.mubr.msk.f32.mxu1 %vm4237_vm0, %v4235_v1 }
  0x69   :  { %3960 = vmatmul.mubr.f32.vlgmr.msra.gmra.mxu0 %v4372_v40  ;;  %3992 = vmatprep.subr.mxu1 %v4235_v1 }
  0x6a   :  { %3968 = vmatpush3.msra.mxu0 %v4397_v45  ;;  %3969 = vmatprep.mubr.msk.f32.mxu0 %vm4237_vm0, %v4235_v1 }
  0x6b   :  { %3977 = vmatprep.subr.mxu0 %v4235_v1  ;;  %3985 = vmatmul.mubr.f32.vlgmr.msra.gmra.mxu1 %v4326_v24 }
  0x6c   :  { %3993 = vmatpush3.msra.mxu1 %v2037_v56  ;;  %3994 = vmatprep.mubr.msk.f32.mxu1 %vm4237_vm0, %v4235_v1 }
  0x6d   :  { %3970 = vmatmul.mubr.f32.vlgmr.msra.gmra.mxu0 %v4335_v30  ;;  %4002 = vmatprep.subr.mxu1 %v4235_v1 }
  0x6e   :  { %3978 = vmatpush3.msra.mxu0 %v1578_v46  ;;  %3979 = vmatprep.mubr.msk.f32.mxu0 %vm4237_vm0, %v4235_v1  ;;  %v1011_v46 = vld [vmem:[#allocation10] sm:$0x3] }
  0x6f   :  { %3987 = vmatprep.subr.mxu0 %v4235_v1  ;;  %3995 = vmatmul.mubr.f32.vlgmr.msra.gmra.mxu1 %v4317_v19 }
  0x70   :  { %4003 = vmatpush3.msra.mxu1 %v4419_v49  ;;  %4004 = vmatprep.mubr.msk.f32.mxu1 %vm4237_vm0, %v4235_v1 }
  0x71   :  { %3980 = vmatmul.mubr.f32.vlgmr.msra.gmra.mxu0 %v4326_v24  ;;  %4012 = vmatprep.subr.mxu1 %v4235_v1 }
  0x72   :  { %3988 = vmatpush3.msra.mxu0 %v4419_v49  ;;  %3989 = vmatprep.mubr.msk.f32.mxu0 %vm4237_vm0, %v4235_v1 }
  0x73   :  { %3997 = vmatprep.subr.mxu0 %v4235_v1  ;;  %4005 = vmatmul.mubr.f32.vlgmr.msra.gmra.mxu1 %v4329_v26 }
  0x74   :  { %4013 = vmatpush3.msra.mxu1 %v4419_v49  ;;  %4014 = vmatprep.mubr.msk.f32.mxu1 %vm4237_vm0, %v4235_v1 }
  0x75   :  { %3990 = vmatmul.mubr.f32.vlgmr.msra.gmra.mxu0 %v4337_v32  ;;  %4022 = vmatprep.subr.mxu1 %v4235_v1 }
  0x76   :  { %3998 = vmatpush3.msra.mxu0 %v4432_v51  ;;  %3999 = vmatprep.mubr.msk.f32.mxu0 %vm4237_vm0, %v4235_v1 }
  0x77   :  { %4007 = vmatprep.subr.mxu0 %v4235_v1  ;;  %4015 = vmatmul.mubr.f32.vlgmr.msra.gmra.mxu1 %v4317_v19 }
  0x78   :  { %4023 = vmatpush3.msra.mxu1 %v2483_v62  ;;  %4024 = vmatprep.mubr.msk.f32.mxu1 %vm4237_vm0, %v4235_v1 }
  0x79   :  { %4000 = vmatmul.mubr.f32.vlgmr.msra.gmra.mxu0 %v4324_v23  ;;  %4032 = vmatprep.subr.mxu1 %v4235_v1 }
  0x7a   :  { %4008 = vmatpush3.msra.mxu0 %v2035_v52  ;;  %4009 = vmatprep.mubr.msk.f32.mxu0 %vm4237_vm0, %v4235_v1 }
  0x7b   :  { %4017 = vmatprep.subr.mxu0 %v4235_v1  ;;  %4025 = vmatmul.mubr.f32.vlgmr.msra.gmra.mxu1 %v4326_v24 }
  0x7c   :  { %4033 = vmatpush3.msra.mxu1 %v4454_v55  ;;  %4034 = vmatprep.mubr.msk.f32.mxu1 %vm4237_vm0, %v4235_v1 }
  0x7d   :  { %4010 = vmatmul.mubr.f32.vlgmr.msra.gmra.mxu0 %v4317_v19  ;;  %4042 = vmatprep.subr.mxu1 %v4235_v1 }
  0x7e   :  { %4018 = vmatpush3.msra.mxu0 %v4454_v55  ;;  %4019 = vmatprep.mubr.msk.f32.mxu0 %vm4237_vm0, %v4235_v1 }
  0x7f   :  { %4027 = vmatprep.subr.mxu0 %v4235_v1  ;;  %4035 = vmatmul.mubr.f32.vlgmr.msra.gmra.mxu1 %v4349_v35 }
  0x80   :  { %4043 = vmatpush3.msra.mxu1 %v4454_v55  ;;  %4044 = vmatprep.mubr.msk.f32.mxu1 %vm4237_vm0, %v4235_v1 }
  0x81   :  { %4020 = vmatmul.mubr.f32.vlgmr.msra.gmra.mxu0 %v4372_v40  ;;  %4052 = vmatprep.subr.mxu1 %v4235_v1 }
  0x82   :  { %4028 = vmatpush3.msra.mxu0 %v4467_v57  ;;  %4029 = vmatprep.mubr.msk.f32.mxu0 %vm4237_vm0, %v4235_v1 }
  0x83   :  { %4037 = vmatprep.subr.mxu0 %v4235_v1  ;;  %4045 = vmatmul.mubr.f32.vlgmr.msra.gmra.mxu1 %v4326_v24 }
  0x84   :  { %4053 = vmatpush3.msra.mxu1 %v2940_v5  ;;  %4054 = vmatprep.mubr.msk.f32.mxu1 %vm4237_vm0, %v4235_v1 }
  0x85   :  { %4030 = vmatmul.mubr.f32.vlgmr.msra.gmra.mxu0 %v4335_v30  ;;  %4062 = vmatprep.subr.mxu1 %v4235_v1 }
  0x86   :  { %4038 = vmatpush3.msra.mxu0 %v2481_v58  ;;  %4039 = vmatprep.mubr.msk.f32.mxu0 %vm4237_vm0, %v4235_v1 }
  0x87   :  { %4047 = vmatprep.subr.mxu0 %v4235_v1  ;;  %4055 = vmatmul.mubr.f32.vlgmr.msra.gmra.mxu1 %v4317_v19 }
  0x88   :  { %4063 = vmatpush3.msra.mxu1 %v4489_v61  ;;  %4064 = vmatprep.mubr.msk.f32.mxu1 %vm4237_vm0, %v4235_v1 }
  0x89   :  { %4040 = vmatmul.mubr.f32.vlgmr.msra.gmra.mxu0 %v4326_v24  ;;  %4072 = vmatprep.subr.mxu1 %v4235_v1 }
  0x8a   :  { %4048 = vmatpush3.msra.mxu0 %v4489_v61  ;;  %4049 = vmatprep.mubr.msk.f32.mxu0 %vm4237_vm0, %v4235_v1 }
  0x8b   :  { %4057 = vmatprep.subr.mxu0 %v4235_v1  ;;  %4065 = vmatmul.mubr.f32.vlgmr.msra.gmra.mxu1 %v4329_v26 }
  0x8c   :  { %4073 = vmatpush3.msra.mxu1 %v4489_v61  ;;  %4074 = vmatprep.mubr.msk.f32.mxu1 %vm4237_vm0, %v4235_v1 }
  0x8d   :  { %4050 = vmatmul.mubr.f32.vlgmr.msra.gmra.mxu0 %v4337_v32  ;;  %4082 = vmatprep.subr.mxu1 %v4235_v1 }
  0x8e   :  { %4058 = vmatpush3.msra.mxu0 %v2937_v63  ;;  %4059 = vmatprep.mubr.msk.f32.mxu0 %vm4237_vm0, %v4235_v1 }
  0x8f   :  { %4067 = vmatprep.subr.mxu0 %v4235_v1  ;;  %4075 = vmatmul.mubr.f32.vlgmr.msra.gmra.mxu1 %v4317_v19 }
  0x90   :  { %4083 = vmatpush3.msra.mxu1 %v3386_v9  ;;  %4084 = vmatprep.mubr.msk.f32.mxu1 %vm4237_vm0, %v4235_v1 }
  0x91   :  { %4060 = vmatmul.mubr.f32.vlgmr.msra.gmra.mxu0 %v4324_v23  ;;  %4092 = vmatprep.subr.mxu1 %v4235_v1 }
  0x92   :  { %4068 = vmatpush3.msra.mxu0 %v2938_v0  ;;  %4069 = vmatprep.mubr.msk.f32.mxu0 %vm4237_vm0, %v4235_v1 }
  0x93   :  { %4077 = vmatprep.subr.mxu0 %v4235_v1  ;;  %4085 = vmatmul.mubr.f32.vlgmr.msra.gmra.mxu1 %v4326_v24 }
  0x94   :  { %4093 = vmatpush3.msra.mxu1 %v4520_v4  ;;  %4094 = vmatprep.mubr.msk.f32.mxu1 %vm4237_vm0, %v4235_v1 }
  0x95   :  { %4070 = vmatmul.mubr.f32.vlgmr.msra.gmra.mxu0 %v4317_v19  ;;  %4102 = vmatprep.subr.mxu1 %v4235_v1 }
  0x96   :  { %4078 = vmatpush3.msra.mxu0 %v4520_v4  ;;  %4079 = vmatprep.mubr.msk.f32.mxu0 %vm4237_vm0, %v4235_v1 }
  0x97   :  { %4087 = vmatprep.subr.mxu0 %v4235_v1  ;;  %4095 = vmatmul.mubr.f32.vlgmr.msra.gmra.mxu1 %v4349_v35 }
  0x98   :  { %4103 = vmatpush3.msra.mxu1 %v4520_v4  ;;  %4104 = vmatprep.mubr.msk.f32.mxu1 %vm4237_vm0, %v4235_v1 }
  0x99   :  { %4080 = vmatmul.mubr.f32.vlgmr.msra.gmra.mxu0 %v4372_v40 }
  0x9a   :  { %4088 = vmatpush3.msra.mxu0 %v3383_v6  ;;  %4089 = vmatprep.mubr.msk.f32.mxu0 %vm4237_vm0, %v4235_v1 }
  0x9b   :  { %4097 = vmatprep.subr.mxu0 %v4235_v1  ;;  %4105 = vmatmul.mubr.f32.vlgmr.msra.gmra.mxu1 %v4326_v24 }
  0x9d   :  { %4090 = vmatmul.mubr.f32.vlgmr.msra.gmra.mxu0 %v4335_v30 }
  0x9e   :  { %4098 = vmatpush3.msra.mxu0 %v3384_v7  ;;  %4099 = vmatprep.mubr.msk.f32.mxu0 %vm4237_vm0, %v4235_v1 }
  0xa1   :  { %4100 = vmatmul.mubr.f32.vlgmr.msra.gmra.mxu0 %v4326_v24 }
  0xb0   :  { %v4602_v61 = vpop.permute.xlu0 %3740 }
  0xfe   :  { %v265_v10 = vpop.f32.mrf.mxu1 }
 0x100   :  { %v3876_v12 = vpop.f32.mrf.mxu1 }
 0x102   :  { %v413_v14 = vpop.f32.mrf.mxu1 }
 0x104   :  { %v3886_v16 = vpop.f32.mrf.mxu1 }
 0x105   :  { %v189_v11 = vpop.f32.mrf.mxu0 }
 0x106   :  { %v266_v23 = vadd.f32 %v265_v10, %v189_v11 }
 0x107   :  { %v3871_v13 = vpop.f32.mrf.mxu0  ;;  %v559_v18 = vpop.f32.mrf.mxu1 }
 0x109   :  { %v339_v15 = vpop.f32.mrf.mxu0  ;;  %v3896_v20 = vpop.f32.mrf.mxu1 }
 0x10a   :  { %v340_v26 = vadd.f32 %v339_v15, %v266_v23 }
 0x10b   :  { %v3881_v17 = vpop.f32.mrf.mxu0  ;;  %v713_v22 = vpop.f32.mrf.mxu1 }
 0x10c   :  { %v414_v31 = vadd.f32 %v413_v14, %v340_v26 }
 0x10d   :  { %v487_v19 = vpop.f32.mrf.mxu0  ;;  %v3906_v1 = vpop.f32.mrf.mxu1 }
 0x10e   :  { %v488_v38 = vadd.f32 %v487_v19, %v414_v31 }
 0x10f   :  { %v3891_v21 = vpop.f32.mrf.mxu0  ;;  %v861_v28 = vpop.f32.mrf.mxu1 }
 0x110   :  { %v560_v45 = vadd.f32 %v559_v18, %v488_v38 }
 0x111   :  { %v637_v25 = vpop.f32.mrf.mxu0  ;;  %v3916_v30 = vpop.f32.mrf.mxu1 }
 0x112   :  { %v714_v24 = vadd.f32 %v713_v22, %v637_v25  ;;  %v1916_v25 = vld [vmem:[#allocation10 + $0x2] sm:$0x3] }
 0x113   :  { %v3901_v27 = vpop.f32.mrf.mxu0  ;;  %v1007_v34 = vpop.f32.mrf.mxu1 }
 0x115   :  { %v787_v29 = vpop.f32.mrf.mxu0  ;;  %v3926_v37 = vpop.f32.mrf.mxu1 }
 0x116   :  { %v788_v32 = vadd.f32 %v787_v29, %v714_v24 }
 0x117   :  { %v3911_v33 = vpop.f32.mrf.mxu0  ;;  %v1171_v41 = vpop.f32.mrf.mxu1 }
 0x118   :  { %v862_v35 = vadd.f32 %v861_v28, %v788_v32 }
 0x119   :  { %v935_v36 = vpop.f32.mrf.mxu0  ;;  %v3936_v44 = vpop.f32.mrf.mxu1 }
 0x11a   :  { %v936_v39 = vadd.f32 %v935_v36, %v862_v35 }
 0x11b   :  { %v3921_v40 = vpop.f32.mrf.mxu0  ;;  %v1319_v49 = vpop.f32.mrf.mxu1 }
 0x11c   :  { %v1008_v42 = vadd.f32 %v1007_v34, %v936_v39 }
 0x11d   :  { %v1095_v43 = vpop.f32.mrf.mxu0  ;;  %v3946_v53 = vpop.f32.mrf.mxu1 }
 0x11e   :  { %v1014_v47 = vrot.slane %v1008_v42, 7  ;;  %v1172_v60 = vadd.f32 %v1171_v41, %v1095_v43 }
 0x11f   :  { %v3931_v48 = vpop.f32.mrf.mxu0  ;;  %v1465_v55 = vpop.f32.mrf.mxu1 }
 0x120   :  { %v1016_v50 = vsel %vm1015_vm3, %v1014_v47, %v560_v45 }
 0x121   :  { %v1018_v51 = vadd.f32 %v1016_v50, %v1011_v46  ;;  %v1245_v52 = vpop.f32.mrf.mxu0  ;;  %v3956_v57 = vpop.f32.mrf.mxu1 }
 0x122   :  { %v1246_v0 = vadd.f32 %v1245_v52, %v1172_v60 }
 0x123   :  { %1020 = vst.msk [vmem:[#allocation10] sm:$0x3] %vm83_vm2, %v1018_v51  ;;  %v3941_v54 = vpop.f32.mrf.mxu0  ;;  %v1617_v59 = vpop.f32.mrf.mxu1 }
 0x124   :  { %v1320_v9 = vadd.f32 %v1319_v49, %v1246_v0  ;;  %v2819_v0 = vld [vmem:[#allocation10 + $0x4] sm:$0x3] }
 0x125   :  { %v1393_v56 = vpop.f32.mrf.mxu0  ;;  %v3966_v63 = vpop.f32.mrf.mxu1 }
 0x126   :  { %v1394_v16 = vadd.f32 %v1393_v56, %v1320_v9 }
 0x127   :  { %v3951_v58 = vpop.f32.mrf.mxu0  ;;  %v1765_v5 = vpop.f32.mrf.mxu1 }
 0x128   :  { %v1466_v23 = vadd.f32 %v1465_v55, %v1394_v16 }
 0x129   :  { %v1541_v62 = vpop.f32.mrf.mxu0  ;;  %v3976_v8 = vpop.f32.mrf.mxu1 }
 0x12a   :  { %v3733_v2 = vld [vmem:[#allocation10] sm:$0x3]  ;;  %v1618_v6 = vadd.f32 %v1617_v59, %v1541_v62 }
 0x12b   :  { %v3743_v3 = vmul.f32 %v4602_v61, %v3733_v2  ;;  %v3961_v4 = vpop.f32.mrf.mxu0  ;;  %v1911_v12 = vpop.f32.mrf.mxu1 }
 0x12d   :  { %3747 = vst.msk [vmem:[#allocation10] sm:$0x3] %vm83_vm2, %v3743_v3  ;;  %v1691_v7 = vpop.f32.mrf.mxu0  ;;  %v3986_v15 = vpop.f32.mrf.mxu1 }
 0x12e   :  { %v1692_v10 = vadd.f32 %v1691_v7, %v1618_v6 }
 0x12f   :  { %v3971_v11 = vpop.f32.mrf.mxu0  ;;  %v2074_v19 = vpop.f32.mrf.mxu1 }
 0x130   :  { %v1766_v13 = vadd.f32 %v1765_v5, %v1692_v10 }
 0x131   :  { %v1839_v14 = vpop.f32.mrf.mxu0  ;;  %v3996_v22 = vpop.f32.mrf.mxu1 }
 0x132   :  { %v1840_v17 = vadd.f32 %v1839_v14, %v1766_v13 }
 0x133   :  { %v3981_v18 = vpop.f32.mrf.mxu0  ;;  %v2222_v27 = vpop.f32.mrf.mxu1 }
 0x134   :  { %v1912_v20 = vadd.f32 %v1911_v12, %v1840_v17 }
 0x135   :  { %v1998_v21 = vpop.f32.mrf.mxu0  ;;  %v4006_v30 = vpop.f32.mrf.mxu1 }
 0x136   :  { %v1919_v1 = vrot.slane %v1912_v20, 7  ;;  %v2075_v37 = vadd.f32 %v2074_v19, %v1998_v21 }
 0x137   :  { %v3991_v26 = vpop.f32.mrf.mxu0  ;;  %v2368_v32 = vpop.f32.mrf.mxu1 }
 0x138   :  { %v1920_v28 = vsel %vm1015_vm3, %v1919_v1, %v1466_v23 }
 0x139   :  { %v1922_v24 = vadd.f32 %v1920_v28, %v1916_v25  ;;  %v2148_v29 = vpop.f32.mrf.mxu0  ;;  %v4016_v34 = vpop.f32.mrf.mxu1 }
 0x13a   :  { %v2149_v40 = vadd.f32 %v2148_v29, %v2075_v37  ;;  %v3722_v37 = vld [vmem:[#allocation10 + $0x6] sm:$0x3] }
 0x13b   :  { %1923 = vst.msk [vmem:[#allocation10 + $0x2] sm:$0x3] %vm83_vm2, %v1922_v24  ;;  %v4001_v31 = vpop.f32.mrf.mxu0  ;;  %v2520_v36 = vpop.f32.mrf.mxu1 }
 0x13c   :  { %v2223_v48 = vadd.f32 %v2222_v27, %v2149_v40 }
 0x13d   :  { %v2296_v33 = vpop.f32.mrf.mxu0  ;;  %v4026_v39 = vpop.f32.mrf.mxu1 }
 0x13e   :  { %v2297_v55 = vadd.f32 %v2296_v33, %v2223_v48 }
 0x13f   :  { %v4011_v35 = vpop.f32.mrf.mxu0  ;;  %v2668_v43 = vpop.f32.mrf.mxu1 }
 0x140   :  { %v2369_v63 = vadd.f32 %v2368_v32, %v2297_v55 }
 0x141   :  { %v2444_v38 = vpop.f32.mrf.mxu0  ;;  %v4036_v47 = vpop.f32.mrf.mxu1 }
 0x142   :  { %v3734_v41 = vld [vmem:[#allocation10 + $0x2] sm:$0x3]  ;;  %v2521_v45 = vadd.f32 %v2520_v36, %v2444_v38 }
 0x143   :  { %v4021_v42 = vpop.f32.mrf.mxu0  ;;  %v3744_v44 = vmul.f32 %v4602_v61, %v3734_v41  ;;  %v2814_v51 = vpop.f32.mrf.mxu1 }
 0x145   :  { %v2594_v46 = vpop.f32.mrf.mxu0  ;;  %3748 = vst.msk [vmem:[#allocation10 + $0x2] sm:$0x3] %vm83_vm2, %v3744_v44  ;;  %v4046_v54 = vpop.f32.mrf.mxu1 }
 0x146   :  { %v2595_v49 = vadd.f32 %v2594_v46, %v2521_v45 }
 0x147   :  { %v4031_v50 = vpop.f32.mrf.mxu0  ;;  %v2977_v58 = vpop.f32.mrf.mxu1 }
 0x148   :  { %v2669_v52 = vadd.f32 %v2668_v43, %v2595_v49 }
 0x149   :  { %v2742_v53 = vpop.f32.mrf.mxu0  ;;  %v4056_v62 = vpop.f32.mrf.mxu1 }
 0x14a   :  { %v2743_v56 = vadd.f32 %v2742_v53, %v2669_v52 }
 0x14b   :  { %v4041_v57 = vpop.f32.mrf.mxu0  ;;  %v3125_v4 = vpop.f32.mrf.mxu1 }
 0x14c   :  { %v2815_v59 = vadd.f32 %v2814_v51, %v2743_v56 }
 0x14d   :  { %v2901_v60 = vpop.f32.mrf.mxu0  ;;  %v4066_v8 = vpop.f32.mrf.mxu1 }
 0x14e   :  { %v2822_v2 = vrot.slane %v2815_v59, 7  ;;  %v2978_v15 = vadd.f32 %v2977_v58, %v2901_v60 }
 0x14f   :  { %v4051_v3 = vpop.f32.mrf.mxu0  ;;  %v3271_v10 = vpop.f32.mrf.mxu1 }
 0x150   :  { %v2823_v5 = vsel %vm1015_vm3, %v2822_v2, %v2369_v63 }
 0x151   :  { %v2825_v6 = vadd.f32 %v2823_v5, %v2819_v0  ;;  %v3051_v7 = vpop.f32.mrf.mxu0  ;;  %v4076_v12 = vpop.f32.mrf.mxu1 }
 0x152   :  { %v3052_v18 = vadd.f32 %v3051_v7, %v2978_v15 }
 0x153   :  { %2826 = vst.msk [vmem:[#allocation10 + $0x4] sm:$0x3] %vm83_vm2, %v2825_v6  ;;  %v4061_v9 = vpop.f32.mrf.mxu0  ;;  %v3423_v14 = vpop.f32.mrf.mxu1 }
 0x154   :  { %v3126_v26 = vadd.f32 %v3125_v4, %v3052_v18 }
 0x155   :  { %v3199_v11 = vpop.f32.mrf.mxu0  ;;  %v4086_v17 = vpop.f32.mrf.mxu1 }
 0x156   :  { %v3200_v32 = vadd.f32 %v3199_v11, %v3126_v26 }
 0x157   :  { %v4071_v13 = vpop.f32.mrf.mxu0  ;;  %v3571_v21 = vpop.f32.mrf.mxu1 }
 0x158   :  { %v3272_v36 = vadd.f32 %v3271_v10, %v3200_v32 }
 0x159   :  { %v3347_v16 = vpop.f32.mrf.mxu0  ;;  %v4096_v1 = vpop.f32.mrf.mxu1 }
 0x15a   :  { %v3735_v19 = vld [vmem:[#allocation10 + $0x4] sm:$0x3]  ;;  %v3424_v23 = vadd.f32 %v3423_v14, %v3347_v16 }
 0x15b   :  { %v4081_v20 = vpop.f32.mrf.mxu0  ;;  %v3745_v22 = vmul.f32 %v4602_v61, %v3735_v19  ;;  %v3717_v24 = vpop.f32.mrf.mxu1 }
 0x15d   :  { %v3497_v25 = vpop.f32.mrf.mxu0  ;;  %3749 = vst.msk [vmem:[#allocation10 + $0x4] sm:$0x3] %vm83_vm2, %v3745_v22  ;;  %v4106_v31 = vpop.f32.mrf.mxu1 }
 0x15e   :  { %v3498_v27 = vadd.f32 %v3497_v25, %v3424_v23 }
 0x15f   :  { %v4091_v28 = vpop.f32.mrf.mxu0 }
 0x160   :  { %v3572_v29 = vadd.f32 %v3571_v21, %v3498_v27 }
 0x161   :  { %v3645_v30 = vpop.f32.mrf.mxu0 }
 0x162   :  { %v3646_v33 = vadd.f32 %v3645_v30, %v3572_v29 }
 0x163   :  { %v4101_v34 = vpop.f32.mrf.mxu0 }
 0x164   :  { %v3718_v35 = vadd.f32 %v3717_v24, %v3646_v33 }
 0x166   :  { %v3725_v38 = vrot.slane %v3718_v35, 7 }
 0x168   :  { %v3726_v39 = vsel %vm1015_vm3, %v3725_v38, %v3272_v36 }
 0x169   :  { %v3728_v40 = vadd.f32 %v3726_v39, %v3722_v37 }
 0x16b   :  { %3729 = vst.msk [vmem:[#allocation10 + $0x6] sm:$0x3] %vm83_vm2, %v3728_v40 }
 0x172   :  { %v3736_v41 = vld [vmem:[#allocation10 + $0x6] sm:$0x3] }
 0x173   :  { %v3746_v42 = vmul.f32 %v4602_v61, %v3736_v41 }
 0x175   :  { %3750 = vst.msk [vmem:[#allocation10 + $0x6] sm:$0x3] %vm83_vm2, %v3746_v42 }
 0x176   :  { %4212 = shalt.err (!%p4209_p10)
}
 0x177   :  { %s4240_s20 = smov 32   ;;  %s4241_s21 = smov 2  }
 0x178   :  { %3762 = dma.vmem_to_hbm [thread:$0]  %s3757_s1, 128, %s4627_s6, [#allocation4], %s4240_s20, %s4240_s20, %s4241_s21  }
 0x179   :  { %4227 = dma.done.wait [#allocation4], 128  }
 0x17a   :  { %4228 = vsyncadd [#allocation4], 4294967168 }
 0x17b   :  { %3766 = vsyncpa [#allocation3], 1 }
 0x17c   :  { %3767 = vsyncpa [#allocation6], 1 }
 0x17d   :  { %3768 = vsyncpa [#allocation9], 1 }
 0x17e   :  { %3769 = vsyncpa [#allocation4], 1 }

</bundles_post_ra>
